<compile_context>
chip_gen: v7x
topology: tpu7x:2x2x1
jax: 0.10.0
libtpu: 0.0.40
codegen_flags: <defaults>
</compile_context>

<pallas_src>
import functools

import jax
import jax.numpy as jnp
from jax.experimental import pallas as pl
from jax.experimental.pallas import tpu as pltpu

BN_EPS = 1e-5
LANE = 128
SUBLANE = 8


def _round_up(n: int, m: int) -> int:
    return (n + m - 1) // m * m


def _pad2(a, rows: int, cols: int):
    r, c = a.shape
    if r == rows and c == cols:
        return a
    return jnp.pad(a, ((0, rows - r), (0, cols - c)))


# --------------------------------------------------------------------------
# Kernel
# --------------------------------------------------------------------------
def _make_mlp_kernel(num_layers: int, eps: float, n_real: int, n_pad: int):
    """Kernel arg order:
         x, [per hidden layer: W (in_p, hid_p) bf16, gb (2, hid_p) f32],
         W_last (in_p, out_p) bf16, b_last (1, out_p) f32, out.

    Hidden-layer Linear biases are intentionally omitted: training-mode
    BatchNorm's batch-mean subtraction cancels them exactly.
    NOTE: one-pass variance (E[z^2] - E[z]^2, clamped at 0) can drift from
    PyTorch's two-pass BN when |mean| >> std; acceptable at these tolerances.
    """
    inv_n = 1.0 / float(n_real)
    needs_row_mask = (n_pad != n_real) and (num_layers > 1)

    def kernel(*refs):
        x_ref = refs[0]
        out_ref = refs[-1]
        p = refs[1:-1]

        h = x_ref[...].astype(jnp.float32)

        if needs_row_mask:
            row_ids = jax.lax.broadcasted_iota(jnp.int32, (n_pad, 1), 0)
            row_mask = (row_ids < n_real).astype(jnp.float32)

        idx = 0
        for _ in range(num_layers - 1):
            w_ref, gb_ref = p[idx:idx + 2]
            idx += 2
            # Linear (bias dropped — cancelled by BN mean): bf16 operands, f32 acc.
            z = jnp.dot(h.astype(w_ref.dtype), w_ref[...],
                        preferred_element_type=jnp.float32)
            # One-pass batch statistics (padded batch rows are exact zeros).
            s1 = jnp.sum(z, axis=0, keepdims=True)
            s2 = jnp.sum(z * z, axis=0, keepdims=True)
            mean = s1 * inv_n
            var = jnp.maximum(s2 * inv_n - mean * mean, 0.0)
            # Folded BN affine + ReLU.  gb_ref row 0 = gamma, row 1 = beta.
            scale = gb_ref[0:1, :] * jax.lax.rsqrt(var + eps)
            shift = gb_ref[1:2, :] - mean * scale
            h = jnp.maximum(z * scale + shift, 0.0)
            if needs_row_mask:
                h = h * row_mask  # keep padded rows at 0 for next layer's stats

        w_ref, b_ref = p[idx:idx + 2]
        y = jnp.dot(h.astype(w_ref.dtype), w_ref[...],
                    preferred_element_type=jnp.float32) + b_ref[...]
        out_ref[...] = y.astype(out_ref.dtype)

    return kernel


# --------------------------------------------------------------------------
# One-time parameter preparation (pad + cast hoisted out of the hot path)
# --------------------------------------------------------------------------
def prepare_mlp_params(params, *, num_layers: int, matmul_dtype=jnp.bfloat16):
    """params is the flat 'logical' (unpadded) list in PyTorch order:
       [W0, b0, gamma0, beta0, ..., W_last, b_last]
       with each W stored as (in_dim, out_dim) (i.e. PyTorch weight.T) and
       b/gamma/beta shaped (1, dim).

    Returns (prepared_ops, meta):
      prepared_ops = [per hidden layer: W bf16 (in_p,hid_p), gb f32 (2,hid_p)]
                     + [W_last bf16 (in_p,out_p), b_last f32 (1,out_p)]
      meta         = {"output_dim": ...}
    Do this ONCE; the results are reused across every mlp_forward call.
    """
    prepared = []
    idx = 0
    in_p = _round_up(params[0].shape[0], LANE)
    for _ in range(num_layers - 1):
        w, _b, g, be = params[idx:idx + 4]  # hidden Linear bias dropped (BN cancels it)
        idx += 4
        hid_p = _round_up(w.shape[1], LANE)
        prepared.append(_pad2(w, in_p, hid_p).astype(matmul_dtype))
        prepared.append(_pad2(jnp.concatenate([g, be], axis=0), 2, hid_p))
        in_p = hid_p
    w, b = params[idx:idx + 2]
    out_dim = w.shape[1]
    out_p = _round_up(out_dim, LANE)
    prepared.append(_pad2(w, in_p, out_p).astype(matmul_dtype))
    prepared.append(_pad2(b, 1, out_p))

    prepared = [jax.block_until_ready(a) for a in prepared]
    return prepared, {"output_dim": out_dim}


# --------------------------------------------------------------------------
# VMEM budgeting (generation-aware, with an explicit fit check)
# --------------------------------------------------------------------------
def _vmem_budget_bytes(n_pad: int, d_in_p: int, out_p: int, prepared) -> int:
    # Operand bytes: padded x (f32) + padded output + all prepared params.
    operand_bytes = n_pad * d_in_p * 4 + n_pad * out_p * 4
    max_width = max(d_in_p, out_p)
    for a in prepared:
        operand_bytes += a.size * jnp.dtype(a.dtype).itemsize
        max_width = max(max_width, a.shape[-1])
    # Intermediates per widest layer: z, z*z, h (f32) + bf16 cast + slack ≈ 4.5x.
    interm_bytes = int(4.5 * n_pad * max_width * 4)
    need = operand_bytes + interm_bytes

    try:
        capacity = int(getattr(pltpu.get_tpu_info(), "vmem_capacity_bytes",
                               64 * 1024 * 1024))
    except Exception:  # no TPU info available at trace time
        capacity = 64 * 1024 * 1024  # conservative: v7x per-TC VMEM

    cap = capacity * 3 // 4  # leave headroom for compiler internal scratch / spill
    budget = min(cap, max(2 * need, 32 * 1024 * 1024))
    if need > budget:
        raise ValueError(
            f"Fused MLP footprint (~{need / 2**20:.1f} MiB) exceeds the safe VMEM "
            f"budget (~{budget / 2**20:.1f} MiB of {capacity / 2**20:.0f} MiB). "
            "Tile the batch over a grid (two-pass BatchNorm) before running at "
            "this size.")
    return int(budget)


# --------------------------------------------------------------------------
# Forward wrapper
# --------------------------------------------------------------------------
def mlp_forward(x, prepared, *, num_layers: int, output_dim: int,
                eps: float = BN_EPS, out_dtype=jnp.float32):
    """x: (N, input_dim) f32.  `prepared` from prepare_mlp_params()."""
    n, d_in = x.shape
    n_pad = _round_up(max(n, SUBLANE), SUBLANE)
    d_in_p = _round_up(d_in, LANE)
    x_p = _pad2(x.astype(jnp.float32), n_pad, d_in_p)

    out_p = prepared[-1].shape[1]  # padded output dim
    vmem_limit = _vmem_budget_bytes(n_pad, d_in_p, out_p, prepared)

    vmem_spec = pl.BlockSpec(memory_space=pltpu.MemorySpace.VMEM)
    kernel = _make_mlp_kernel(num_layers, eps, n, n_pad)

    y_pad = pl.pallas_call(
        kernel,
        out_shape=jax.ShapeDtypeStruct((n_pad, out_p), out_dtype),
        in_specs=[vmem_spec] * (1 + len(prepared)),
        out_specs=vmem_spec,
        compiler_params=pltpu.CompilerParams(vmem_limit_bytes=vmem_limit),
    )(x_p, *prepared)

    return y_pad[:n, :output_dim]


# --------------------------------------------------------------------------
# PyTorch-style init + pure-JAX reference
# --------------------------------------------------------------------------
def init_mlp_params(key, num_layers, input_dim, hidden_dim, output_dim):
    """U(-1/sqrt(fan_in), 1/sqrt(fan_in)) for Linear W/b; gamma=1, beta=0 for BN."""
    if num_layers < 1:
        raise ValueError("number of layers should be positive!")

    dims = ([(input_dim, output_dim)] if num_layers == 1 else
            [(input_dim, hidden_dim)] +
            [(hidden_dim, hidden_dim)] * (num_layers - 2) +
            [(hidden_dim, output_dim)])

    params = []
    keys = jax.random.split(key, 2 * len(dims))
    for i, (fan_in, fan_out) in enumerate(dims):
        bound = 1.0 / (fan_in ** 0.5)
        w = jax.random.uniform(keys[2 * i], (fan_in, fan_out), jnp.float32,
                               -bound, bound)          # stored as (in, out) == W^T
        b = jax.random.uniform(keys[2 * i + 1], (1, fan_out), jnp.float32,
                               -bound, bound)
        params.append(w)
        params.append(b)
        if i < len(dims) - 1:  # hidden layers get a BatchNorm1d(hidden_dim)
            params.append(jnp.ones((1, fan_out), jnp.float32))   # gamma
            params.append(jnp.zeros((1, fan_out), jnp.float32))  # beta
    return params


def mlp_reference(x, params, num_layers, eps=BN_EPS, matmul_dtype=jnp.bfloat16):
    """Pure-JAX reference (keeps the Linear bias and the textbook two-pass BN);
    dots use the same bf16-operand / f32-accumulate numerics as the kernel."""
    def dot(a, w):
        return jnp.dot(a.astype(matmul_dtype), w.astype(matmul_dtype),
                       preferred_element_type=jnp.float32)

    h = x.astype(jnp.float32)
    idx = 0
    for _ in range(num_layers - 1):
        w, b, g, be = params[idx:idx + 4]
        idx += 4
        z = dot(h, w) + b
        mean = jnp.mean(z, axis=0, keepdims=True)
        var = jnp.mean((z - mean) ** 2, axis=0, keepdims=True)
        z = (z - mean) / jnp.sqrt(var + eps) * g + be
        h = jnp.maximum(z, 0.0)
    w, b = params[idx:idx + 2]
    return dot(h, w) + b


if __name__ == "__main__":
    num_layers, input_dim, hidden_dim, output_dim = 3, 16, 32, 8
    batch = 12  # deliberately not a multiple of 8 to exercise the row-mask path

    key = jax.random.PRNGKey(0)
    k_x, k_p = jax.random.split(key)
    x = jax.random.normal(k_x, (batch, input_dim), jnp.float32)
    params = init_mlp_params(k_p, num_layers, input_dim, hidden_dim, output_dim)

    # One-time weight pad / bf16 cast (hoisted out of the per-call path).
    prepared, meta = prepare_mlp_params(params, num_layers=num_layers)

    run = jax.jit(functools.partial(mlp_forward, num_layers=num_layers,
                                    output_dim=meta["output_dim"]))
    y = jax.block_until_ready(run(x, prepared))

    y_ref = mlp_reference(x, params, num_layers)
    assert y.shape == (batch, output_dim)
    assert jnp.allclose(y, y_ref, atol=2e-2, rtol=2e-2), "mismatch vs reference"

    print("KERNEL_OK")
</pallas_src>

<mosaic_0001>
module attributes {stable_mosaic.version = 11 : i64} {
  func.func @kernel(%arg0: memref<16x128xf32, #tpu.memory_space<vmem>>, %arg1: memref<128x128xbf16, #tpu.memory_space<vmem>>, %arg2: memref<2x128xf32, #tpu.memory_space<vmem>>, %arg3: memref<128x128xbf16, #tpu.memory_space<vmem>>, %arg4: memref<2x128xf32, #tpu.memory_space<vmem>>, %arg5: memref<128x128xbf16, #tpu.memory_space<vmem>>, %arg6: memref<1x128xf32, #tpu.memory_space<vmem>>, %arg7: memref<16x128xf32, #tpu.memory_space<vmem>>) attributes {dimension_semantics = [], scalar_prefetch = 0 : i64, scratch_operands = 0 : i64, tpu.core_type = #tpu.core_type<tc>} {
    %c0 = arith.constant 0 : index
    %c0_0 = arith.constant 0 : index
    %0 = vector.load %arg0[%c0, %c0_0] : memref<16x128xf32, #tpu.memory_space<vmem>>, vector<16x128xf32>
    %1 = tpu.iota {dimensions = array<i32: 0>} : vector<16x1xi32>
    %c12_i32 = arith.constant 12 : i32
    %2 = vector.broadcast %c12_i32 : i32 to vector<16x1xi32>
    %3 = arith.cmpi slt, %1, %2 : vector<16x1xi32>
    %4 = arith.extui %3 : vector<16x1xi1> to vector<16x1xi32>
    %5 = arith.sitofp %4 : vector<16x1xi32> to vector<16x1xf32>
    %6 = arith.truncf %0 : vector<16x128xf32> to vector<16x128xbf16>
    %c0_1 = arith.constant 0 : index
    %c0_2 = arith.constant 0 : index
    %7 = vector.load %arg1[%c0_1, %c0_2] : memref<128x128xbf16, #tpu.memory_space<vmem>>, vector<128x128xbf16>
    %cst = arith.constant dense<0.000000e+00> : vector<16x128xf32>
    %8 = tpu.matmul %6, %7, %cst {dimension_numbers = #tpu.dot_dimension_numbers<[1], [0], [0], [1], [0, 0, 1, 1], [], []>} : vector<16x128xbf16>, vector<128x128xbf16>, vector<16x128xf32> -> vector<16x128xf32>
    %cst_3 = arith.constant dense<0.000000e+00> : vector<128xf32>
    %9 = vector.multi_reduction <add>, %8, %cst_3 [0] : vector<16x128xf32> to vector<128xf32>
    %10 = vector.shape_cast %9 : vector<128xf32> to vector<1x128xf32>
    %11 = arith.mulf %8, %8 : vector<16x128xf32>
    %cst_4 = arith.constant dense<0.000000e+00> : vector<128xf32>
    %12 = vector.multi_reduction <add>, %11, %cst_4 [0] : vector<16x128xf32> to vector<128xf32>
    %13 = vector.shape_cast %12 : vector<128xf32> to vector<1x128xf32>
    %cst_5 = arith.constant 0.0833333358 : f32
    %14 = vector.broadcast %cst_5 : f32 to vector<1x128xf32>
    %15 = arith.mulf %10, %14 : vector<1x128xf32>
    %cst_6 = arith.constant 0.0833333358 : f32
    %16 = vector.broadcast %cst_6 : f32 to vector<1x128xf32>
    %17 = arith.mulf %13, %16 : vector<1x128xf32>
    %18 = arith.mulf %15, %15 : vector<1x128xf32>
    %19 = arith.subf %17, %18 : vector<1x128xf32>
    %cst_7 = arith.constant 0.000000e+00 : f32
    %20 = vector.broadcast %cst_7 : f32 to vector<1x128xf32>
    %21 = arith.maximumf %19, %20 : vector<1x128xf32>
    %c0_8 = arith.constant 0 : index
    %c0_9 = arith.constant 0 : index
    %22 = vector.load %arg2[%c0_8, %c0_9] : memref<2x128xf32, #tpu.memory_space<vmem>>, vector<1x128xf32>
    %cst_10 = arith.constant 9.99999974E-6 : f32
    %23 = vector.broadcast %cst_10 : f32 to vector<1x128xf32>
    %24 = arith.addf %21, %23 : vector<1x128xf32>
    %25 = math.rsqrt %24 : vector<1x128xf32>
    %26 = arith.mulf %22, %25 : vector<1x128xf32>
    %c1 = arith.constant 1 : index
    %c0_11 = arith.constant 0 : index
    %27 = vector.load %arg2[%c1, %c0_11] : memref<2x128xf32, #tpu.memory_space<vmem>>, vector<1x128xf32>
    %28 = arith.mulf %15, %26 : vector<1x128xf32>
    %29 = arith.subf %27, %28 : vector<1x128xf32>
    %30 = vector.broadcast %26 : vector<1x128xf32> to vector<16x128xf32>
    %31 = arith.mulf %8, %30 : vector<16x128xf32>
    %32 = vector.broadcast %29 : vector<1x128xf32> to vector<16x128xf32>
    %33 = arith.addf %31, %32 : vector<16x128xf32>
    %cst_12 = arith.constant 0.000000e+00 : f32
    %34 = vector.broadcast %cst_12 : f32 to vector<16x128xf32>
    %35 = arith.maximumf %33, %34 : vector<16x128xf32>
    %36 = vector.broadcast %5 : vector<16x1xf32> to vector<16x128xf32>
    %37 = arith.mulf %35, %36 : vector<16x128xf32>
    %38 = arith.truncf %37 : vector<16x128xf32> to vector<16x128xbf16>
    %c0_13 = arith.constant 0 : index
    %c0_14 = arith.constant 0 : index
    %39 = vector.load %arg3[%c0_13, %c0_14] : memref<128x128xbf16, #tpu.memory_space<vmem>>, vector<128x128xbf16>
    %cst_15 = arith.constant dense<0.000000e+00> : vector<16x128xf32>
    %40 = tpu.matmul %38, %39, %cst_15 {dimension_numbers = #tpu.dot_dimension_numbers<[1], [0], [0], [1], [0, 0, 1, 1], [], []>} : vector<16x128xbf16>, vector<128x128xbf16>, vector<16x128xf32> -> vector<16x128xf32>
    %cst_16 = arith.constant dense<0.000000e+00> : vector<128xf32>
    %41 = vector.multi_reduction <add>, %40, %cst_16 [0] : vector<16x128xf32> to vector<128xf32>
    %42 = vector.shape_cast %41 : vector<128xf32> to vector<1x128xf32>
    %43 = arith.mulf %40, %40 : vector<16x128xf32>
    %cst_17 = arith.constant dense<0.000000e+00> : vector<128xf32>
    %44 = vector.multi_reduction <add>, %43, %cst_17 [0] : vector<16x128xf32> to vector<128xf32>
    %45 = vector.shape_cast %44 : vector<128xf32> to vector<1x128xf32>
    %cst_18 = arith.constant 0.0833333358 : f32
    %46 = vector.broadcast %cst_18 : f32 to vector<1x128xf32>
    %47 = arith.mulf %42, %46 : vector<1x128xf32>
    %cst_19 = arith.constant 0.0833333358 : f32
    %48 = vector.broadcast %cst_19 : f32 to vector<1x128xf32>
    %49 = arith.mulf %45, %48 : vector<1x128xf32>
    %50 = arith.mulf %47, %47 : vector<1x128xf32>
    %51 = arith.subf %49, %50 : vector<1x128xf32>
    %cst_20 = arith.constant 0.000000e+00 : f32
    %52 = vector.broadcast %cst_20 : f32 to vector<1x128xf32>
    %53 = arith.maximumf %51, %52 : vector<1x128xf32>
    %c0_21 = arith.constant 0 : index
    %c0_22 = arith.constant 0 : index
    %54 = vector.load %arg4[%c0_21, %c0_22] : memref<2x128xf32, #tpu.memory_space<vmem>>, vector<1x128xf32>
    %cst_23 = arith.constant 9.99999974E-6 : f32
    %55 = vector.broadcast %cst_23 : f32 to vector<1x128xf32>
    %56 = arith.addf %53, %55 : vector<1x128xf32>
    %57 = math.rsqrt %56 : vector<1x128xf32>
    %58 = arith.mulf %54, %57 : vector<1x128xf32>
    %c1_24 = arith.constant 1 : index
    %c0_25 = arith.constant 0 : index
    %59 = vector.load %arg4[%c1_24, %c0_25] : memref<2x128xf32, #tpu.memory_space<vmem>>, vector<1x128xf32>
    %60 = arith.mulf %47, %58 : vector<1x128xf32>
    %61 = arith.subf %59, %60 : vector<1x128xf32>
    %62 = vector.broadcast %58 : vector<1x128xf32> to vector<16x128xf32>
    %63 = arith.mulf %40, %62 : vector<16x128xf32>
    %64 = vector.broadcast %61 : vector<1x128xf32> to vector<16x128xf32>
    %65 = arith.addf %63, %64 : vector<16x128xf32>
    %cst_26 = arith.constant 0.000000e+00 : f32
    %66 = vector.broadcast %cst_26 : f32 to vector<16x128xf32>
    %67 = arith.maximumf %65, %66 : vector<16x128xf32>
    %68 = vector.broadcast %5 : vector<16x1xf32> to vector<16x128xf32>
    %69 = arith.mulf %67, %68 : vector<16x128xf32>
    %70 = arith.truncf %69 : vector<16x128xf32> to vector<16x128xbf16>
    %c0_27 = arith.constant 0 : index
    %c0_28 = arith.constant 0 : index
    %71 = vector.load %arg5[%c0_27, %c0_28] : memref<128x128xbf16, #tpu.memory_space<vmem>>, vector<128x128xbf16>
    %cst_29 = arith.constant dense<0.000000e+00> : vector<16x128xf32>
    %72 = tpu.matmul %70, %71, %cst_29 {dimension_numbers = #tpu.dot_dimension_numbers<[1], [0], [0], [1], [0, 0, 1, 1], [], []>} : vector<16x128xbf16>, vector<128x128xbf16>, vector<16x128xf32> -> vector<16x128xf32>
    %c0_30 = arith.constant 0 : index
    %c0_31 = arith.constant 0 : index
    %73 = vector.load %arg6[%c0_30, %c0_31] : memref<1x128xf32, #tpu.memory_space<vmem>>, vector<1x128xf32>
    %74 = vector.broadcast %73 : vector<1x128xf32> to vector<16x128xf32>
    %75 = arith.addf %72, %74 : vector<16x128xf32>
    %c0_32 = arith.constant 0 : index
    %c0_33 = arith.constant 0 : index
    %76 = vector.load %arg7[%c0_32, %c0_33] : memref<16x128xf32, #tpu.memory_space<vmem>>, vector<16x128xf32>
    tpu.vector_store %arg7[%c0_32, %c0_33], %75 {strides = array<i32>} : memref<16x128xf32, #tpu.memory_space<vmem>>, vector<16x128xf32>,
    return
  }
}

</mosaic_0001>

<bundles_post_ra>
// kernel: mlp_forward.1
= control target key start
LH: loop header
LB: loop body
LE: loop exit
PB: predicated region body
PF: predicated region fallthrough
CT: control target
= control target key end

     0   :  { %12 = vsyncpa [#allocation3], 0  ;;  %s885_s0 = inlined_call_operand.vmem [shape: f32[16,128], index: 0, kind: input, shape index: {}]   ;;  %s886_s1 = inlined_call_operand.hbm [shape: bf16[128,128], index: 1, kind: input, shape index: {}]   ;;  %s887_s2 = inlined_call_operand.vmem [shape: f32[2,128], index: 2, kind: input, shape index: {}]   ;;  %s888_s3 = inlined_call_operand.hbm [shape: bf16[128,128], index: 3, kind: input, shape index: {}]   ;;  %s889_s4 = inlined_call_operand.vmem [shape: f32[2,128], index: 4, kind: input, shape index: {}]   ;;  %s890_s5 = inlined_call_operand.hbm [shape: bf16[128,128], index: 5, kind: input, shape index: {}]   ;;  %s891_s6 = inlined_call_operand.vmem [shape: f32[1,128], index: 6, kind: input, shape index: {}]   ;;  %s892_s7 = inlined_call_operand.vmem [shape: f32[16,128], index: 7, kind: output, shape index: {}]  }
   0x1   :  { %13 = vsyncpa [#allocation5], 0  ;;  %s718_s24 = smov [#allocation4]   ;;  %s719_s26 = smov [#allocation2]  }
   0x2   :  { %s35_s25 = sshll.u32 %s718_s24, 4  ;;  %s21_s27 = sshll.u32 %s719_s26, 4  ;;  %s36_s25 = int_to_ptr.vmem [resolvable:$true] %s35_s25  ;;  %s765_s27 = int_to_ptr.vmem [resolvable:$true] %s21_s27 }
   0x3   :  { %s648_s30 = scalar_lea.hbm %s888_s3, 1024 }
   0x4   :  { %p649_p0 = scmp.ne.s32.totalorder %s888_s3, %s648_s30  ;;  %p652_p1 = scmp.lt.u32.totalorder %s648_s30, %s888_s3 }
   0x6   :  { %p654_p2 = pnand %p652_p1, %p649_p0 }
   0x8   :  { %657 = shalt.err (!%p654_p2)
}
   0x9   :  { %s658_s12 = scalar_lea.vmem %s36_s25, 1024  ;;  %p663_p4 = scmp.lt.s32.totalorder %s36_s25, %s36_s25 }
   0xa   :  { %p659_p3 = scmp.ne.s32.totalorder %s36_s25, %s658_s12  ;;  %p664_p5 = scmp.lt.s32.totalorder %s658_s12, %s658_s12 }
   0xc   :  { %p665_p6 = por %p664_p5, %p663_p4 }
   0xe   :  { %p666_p7 = pnand %p665_p6, %p659_p3 }
  0x10   :  { %669 = shalt.err (!%p666_p7)
}
  0x11   :  { %s720_s13 = smov 64   ;;  %s721_s14 = smov 4  }
  0x12   :  { %41 = dma.hbm_to_vmem [thread:$0]  %s888_s3, 1024, %s36_s25, [#allocation5], %s720_s13, %s720_s13, %s721_s14  }
  0x13   :  { %s670_s19 = scalar_lea.hbm %s886_s1, 1024 }
  0x14   :  { %p671_p8 = scmp.ne.s32.totalorder %s886_s1, %s670_s19  ;;  %p674_p9 = scmp.lt.u32.totalorder %s670_s19, %s886_s1 }
  0x16   :  { %p676_p10 = pnand %p674_p9, %p671_p8 }
  0x18   :  { %679 = shalt.err (!%p676_p10)
}
  0x19   :  { %s680_s24 = scalar_lea.vmem %s765_s27, 1024  ;;  %p685_p12 = scmp.lt.s32.totalorder %s765_s27, %s765_s27 }
  0x1a   :  { %p681_p11 = scmp.ne.s32.totalorder %s765_s27, %s680_s24  ;;  %p686_p13 = scmp.lt.s32.totalorder %s680_s24, %s680_s24 }
  0x1c   :  { %p687_p0 = por %p686_p13, %p685_p12 }
  0x1e   :  { %p688_p1 = pnand %p687_p0, %p681_p11 }
  0x20   :  { %691 = shalt.err (!%p688_p1)
}
  0x21   :  { %27 = dma.hbm_to_vmem [thread:$0]  %s886_s1, 1024, %s765_s27, [#allocation3], %s720_s13, %s720_s13, %s721_s14  }
  0x22   :  { %s722_s26 = smov [#allocation6]   ;;  %s692_s8 = scalar_lea.hbm %s890_s5, 1024 }
  0x23   :  { %s49_s28 = sshll.u32 %s722_s26, 4  ;;  %p693_p2 = scmp.ne.s32.totalorder %s890_s5, %s692_s8  ;;  %s50_s28 = int_to_ptr.vmem [resolvable:$true] %s49_s28 }
  0x24   :  { %p696_p3 = scmp.lt.u32.totalorder %s692_s8, %s890_s5 }
  0x26   :  { %p698_p4 = pnand %p696_p3, %p693_p2 }
  0x28   :  { %701 = shalt.err (!%p698_p4)
}
  0x29   :  { %s702_s15 = scalar_lea.vmem %s50_s28, 1024  ;;  %p707_p6 = scmp.lt.s32.totalorder %s50_s28, %s50_s28 }
  0x2a   :  { %p703_p5 = scmp.ne.s32.totalorder %s50_s28, %s702_s15  ;;  %p708_p7 = scmp.lt.s32.totalorder %s702_s15, %s702_s15 }
  0x2c   :  { %p709_p8 = por %p708_p7, %p707_p6 }
  0x2e   :  { %p710_p9 = pnand %p709_p8, %p703_p5 }
  0x30   :  { %713 = shalt.err (!%p710_p9)
}
  0x31   :  { %55 = dma.hbm_to_vmem [thread:$0]  %s890_s5, 1024, %s50_s28, [#allocation5], %s720_s13, %s720_s13, %s721_s14  }
  0x32   :  { %714 = dma.done.wait [#allocation3], 1024  }
  0x33   :  { %715 = vsyncadd [#allocation3], 4294966272 }
  0x34   :  { %716 = dma.done.wait [#allocation5], 2048  }
  0x35   :  { %717 = vsyncadd [#allocation5], 4294965248  ;;  %v723_v0 = vmov 0.0   ;;  %vm724_vm0 = vmmov 0   ;;  %v620_v1 = vld [vmem:[#allocation2] sm:$0xff]   ;;  %v621_v2 = vld [vmem:[#allocation2 + $0x8] sm:$0xff]   ;;  %v70_v46 = vlaneseq }
  0x36   :  { %553 = vmatprep.subr.bf16.mxu0 %v723_v0  ;;  %569 = vmatprep.mubr.msk.bf16.mxu0 %vm724_vm0, %v723_v0  ;;  %v622_v3 = vld [vmem:[#allocation2 + $0x10] sm:$0xff]   ;;  %v623_v4 = vld [vmem:[#allocation2 + $0x18] sm:$0xff]   ;;  %v624_v5 = vld [vmem:[#allocation2 + $0x20] sm:$0xff]  }
  0x37   :  { %573 = vmatprep.subr.bf16.mxu1 %v723_v0  ;;  %589 = vmatprep.mubr.msk.bf16.mxu1 %vm724_vm0, %v723_v0  ;;  %v625_v6 = vld [vmem:[#allocation2 + $0x28] sm:$0xff]   ;;  %v626_v7 = vld [vmem:[#allocation2 + $0x30] sm:$0xff]   ;;  %v627_v8 = vld [vmem:[#allocation2 + $0x38] sm:$0xff]   ;;  %v71_v47 = vshrl.u32 %v70_v46, 7 }
  0x38   :  { %554 = vmatpush3.bf16.msra.mxu0 %v620_v1  ;;  %v68_v9 = vld [vmem:[%s885_s0] sm:$0xff]  ;;  %v69_v10 = vld [vmem:[%s885_s0 + $0x8] sm:$0xff]  ;;  %v630_v14 = vld [vmem:[#allocation4 + $0x10] sm:$0xff]  }
  0x39   :  { %555 = vmatprep.subr.bf16.mxu0 %v723_v0  ;;  %v79_v11 = vpack.c.bf16 %v69_v10, %v68_v9  ;;  %v628_v12 = vld [vmem:[#allocation4] sm:$0xff]   ;;  %v629_v13 = vld [vmem:[#allocation4 + $0x8] sm:$0xff]   ;;  %v631_v15 = vld [vmem:[#allocation4 + $0x18] sm:$0xff]   ;;  %v849_v49 = vsub.s32 0, %v71_v47  ;;  %v72_v55 = vadd.s32 8, %v71_v47 }
  0x3a   :  { %574 = vmatpush3.bf16.msra.mxu1 %v628_v12  ;;  %v632_v16 = vld [vmem:[#allocation4 + $0x20] sm:$0xff]   ;;  %v633_v17 = vld [vmem:[#allocation4 + $0x28] sm:$0xff]   ;;  %v634_v18 = vld [vmem:[#allocation4 + $0x30] sm:$0xff]  }
  0x3b   :  { %575 = vmatprep.subr.bf16.mxu1 %v723_v0  ;;  %v635_v19 = vld [vmem:[#allocation4 + $0x38] sm:$0xff]   ;;  %v206_v48 = vld [vmem:[%s887_s2] sm:$0x1]  ;;  %v210_v52 = vld [vmem:[%s887_s2 + $0x1] sm:$0x1]  ;;  %vm74_vm1 = vcmp.lt.s32.totalorder %v72_v55, 12 }
  0x3c   :  { %556 = vmatpush3.bf16.msra.mxu0 %v621_v2  ;;  %v857_v62 = vsel %vm74_vm1, 1.0, %v723_v0  ;;  %v641_v9 = vld [vmem:[#allocation6 + $0x28] sm:$0xff]   ;;  %v642_v10 = vld [vmem:[#allocation6 + $0x30] sm:$0xff]  }
  0x3d   :  { %557 = vmatprep.subr.bf16.mxu0 %v723_v0 }
  0x3e   :  { %576 = vmatpush3.bf16.msra.mxu1 %v629_v13 }
  0x3f   :  { %577 = vmatprep.subr.bf16.mxu1 %v723_v0 }
  0x40   :  { %558 = vmatpush3.bf16.msra.mxu0 %v622_v3 }
  0x41   :  { %559 = vmatprep.subr.bf16.mxu0 %v723_v0 }
  0x42   :  { %578 = vmatpush3.bf16.msra.mxu1 %v630_v14 }
  0x43   :  { %579 = vmatprep.subr.bf16.mxu1 %v723_v0 }
  0x44   :  { %560 = vmatpush3.bf16.msra.mxu0 %v623_v4  ;;  %v636_v4 = vld [vmem:[#allocation6] sm:$0xff]  }
  0x45   :  { %561 = vmatprep.subr.bf16.mxu0 %v723_v0 }
  0x46   :  { %580 = vmatpush3.bf16.msra.mxu1 %v631_v15 }
  0x47   :  { %581 = vmatprep.subr.bf16.mxu1 %v723_v0 }
  0x48   :  { %562 = vmatpush3.bf16.msra.mxu0 %v624_v5  ;;  %v637_v5 = vld [vmem:[#allocation6 + $0x8] sm:$0xff]  }
  0x49   :  { %563 = vmatprep.subr.bf16.mxu0 %v723_v0 }
  0x4a   :  { %582 = vmatpush3.bf16.msra.mxu1 %v632_v16 }
  0x4b   :  { %583 = vmatprep.subr.bf16.mxu1 %v723_v0 }
  0x4c   :  { %564 = vmatpush3.bf16.msra.mxu0 %v625_v6  ;;  %v638_v6 = vld [vmem:[#allocation6 + $0x10] sm:$0xff]  }
  0x4d   :  { %565 = vmatprep.subr.bf16.mxu0 %v723_v0 }
  0x4e   :  { %584 = vmatpush3.bf16.msra.mxu1 %v633_v17 }
  0x4f   :  { %585 = vmatprep.subr.bf16.mxu1 %v723_v0 }
  0x50   :  { %566 = vmatpush3.bf16.msra.mxu0 %v626_v7  ;;  %v639_v7 = vld [vmem:[#allocation6 + $0x18] sm:$0xff]  }
  0x51   :  { %567 = vmatprep.subr.bf16.mxu0 %v723_v0 }
  0x52   :  { %586 = vmatpush3.bf16.msra.mxu1 %v634_v18 }
  0x53   :  { %587 = vmatprep.subr.bf16.mxu1 %v723_v0 }
  0x54   :  { %568 = vmatpush3.bf16.msra.mxu0 %v627_v8  ;;  %v640_v8 = vld [vmem:[#allocation6 + $0x20] sm:$0xff]  }
  0x55   :  { %593 = vmatprep.subr.bf16.mxu0 %v723_v0 }
  0x56   :  { %588 = vmatpush3.bf16.msra.mxu1 %v635_v19 }
  0x57   :  { %570 = vmatmul.mubr.bf16.vlgmr.msra.gmra.mrb[0].mxu0 %v79_v11  ;;  %v643_v11 = vld [vmem:[#allocation6 + $0x38] sm:$0xff]  }
  0x58   :  { %609 = vmatprep.mubr.msk.bf16.mxu0 %vm724_vm0, %v723_v0  ;;  %594 = vmatpush3.bf16.msra.mxu0 %v636_v4 }
  0x59   :  { %595 = vmatprep.subr.bf16.mxu0 %v723_v0 }
  0x5c   :  { %596 = vmatpush3.bf16.msra.mxu0 %v637_v5 }
  0x5d   :  { %597 = vmatprep.subr.bf16.mxu0 %v723_v0 }
  0x60   :  { %598 = vmatpush3.bf16.msra.mxu0 %v638_v6 }
  0x61   :  { %599 = vmatprep.subr.bf16.mxu0 %v723_v0 }
  0x64   :  { %600 = vmatpush3.bf16.msra.mxu0 %v639_v7 }
  0x65   :  { %601 = vmatprep.subr.bf16.mxu0 %v723_v0 }
  0x68   :  { %602 = vmatpush3.bf16.msra.mxu0 %v640_v8 }
  0x69   :  { %603 = vmatprep.subr.bf16.mxu0 %v723_v0 }
  0x6c   :  { %604 = vmatpush3.bf16.msra.mxu0 %v641_v9 }
  0x6d   :  { %605 = vmatprep.subr.bf16.mxu0 %v723_v0 }
  0x70   :  { %606 = vmatpush3.bf16.msra.mxu0 %v642_v10 }
  0x71   :  { %607 = vmatprep.subr.bf16.mxu0 %v723_v0 }
  0x74   :  { %608 = vmatpush3.bf16.msra.mxu0 %v643_v11 }
 0x12a   :  { %v178_v20 = vpop.f32.mrb[0].mxu0 }
 0x12b   :  { %v571_v21 = vpop.f32.mrb[1].mxu0  ;;  %v192_v23 = vmul.f32 %v178_v20, %v178_v20 }
 0x12c   :  { %v181_v22 = vpop.f32.mrb[2].mxu0 }
 0x12d   :  { %v185_v24 = vadd.f32 %v181_v22, %v178_v20  ;;  %v193_v25 = vmul.f32 %v181_v22, %v181_v22  ;;  %v572_v26 = vpop.f32.mrb[3].mxu0 }
 0x12f   :  { %v186_v27 = vrot.slane %v185_v24, 4  ;;  %v194_v28 = vadd.f32 %v193_v25, %v192_v23 }
 0x131   :  { %v187_v29 = vadd.f32 %v186_v27, %v185_v24  ;;  %v195_v30 = vrot.slane %v194_v28, 4 }
 0x133   :  { %v188_v31 = vrot.slane %v187_v29, 2  ;;  %v196_v32 = vadd.f32 %v195_v30, %v194_v28 }
 0x135   :  { %v189_v33 = vadd.f32 %v188_v31, %v187_v29  ;;  %v197_v34 = vrot.slane %v196_v32, 2 }
 0x137   :  { %v190_v35 = vrot.slane %v189_v33, 1  ;;  %v198_v36 = vadd.f32 %v197_v34, %v196_v32 }
 0x139   :  { %v191_v37 = vadd.f32 %v190_v35, %v189_v33  ;;  %v199_v38 = vrot.slane %v198_v36, 1 }
 0x13b   :  { %v200_v39 = vadd.f32 %v199_v38, %v198_v36  ;;  %v201_v40 = vmul.f32 0.083333336, %v191_v37  ;;  %v356_v37 = vld [vmem:[%s889_s4] sm:$0x1] }
 0x13d   :  { %v202_v41 = vmul.f32 0.083333336, %v200_v39  ;;  %v203_v42 = vmul.f32 %v201_v40, %v201_v40 }
 0x13f   :  { %v204_v43 = vsub.f32 %v202_v41, %v203_v42 }
 0x141   :  { %v205_v44 = vmax.f32 %v204_v43, 0.0 }
 0x143   :  { %v207_v45 = vadd.f32 1e-05, %v205_v44 }
 0x145   :  { %644 = vrsqrt.f32 %v207_v45 }
 0x14f   :  { %v645_v50 = vpop.eup %644 }
 0x150   :  { %v209_v51 = vmul.f32 %v645_v50, %v206_v48 }
 0x152   :  { %v211_v53 = vmul.f32 %v209_v51, %v201_v40  ;;  %v216_v54 = vrot.slane %v209_v51, %v849_v49  ;;  %v360_v40 = vld [vmem:[%s889_s4 + $0x1] sm:$0x1] }
 0x154   :  { %v212_v56 = vsub.f32 %v210_v52, %v211_v53  ;;  %v217_v57 = vmul.f32 %v216_v54, %v178_v20  ;;  %v218_v58 = vmul.f32 %v216_v54, %v181_v22  ;;  %v517_v54 = vld [vmem:[%s891_s6] ss:$0 sm:$0xff] }
 0x156   :  { %v222_v59 = vrot.slane %v212_v56, %v849_v49 }
 0x158   :  { %v224_v60 = vadd.f32 %v222_v59, %v218_v58  ;;  %v223_v61 = vadd.f32 %v222_v59, %v217_v57 }
 0x15a   :  { %v226_v63 = vmax.f32 %v224_v60, 0.0  ;;  %v225_v1 = vmax.f32 %v223_v61, 0.0 }
 0x15c   :  { %v228_v2 = vmul.f32 %v857_v62, %v226_v63 }
 0x15e   :  { %v229_v3 = vpack.c.bf16 %v228_v2, %v225_v1 }
 0x160   :  { %590 = vmatmul.mubr.bf16.vlgmr.msra.gmra.mrb[0].mxu1 %v229_v3 }
 0x233   :  { %v328_v12 = vpop.f32.mrb[0].mxu1 }
 0x234   :  { %v591_v13 = vpop.f32.mrb[1].mxu1  ;;  %v342_v15 = vmul.f32 %v328_v12, %v328_v12 }
 0x235   :  { %v331_v14 = vpop.f32.mrb[2].mxu1 }
 0x236   :  { %v335_v16 = vadd.f32 %v331_v14, %v328_v12  ;;  %v343_v17 = vmul.f32 %v331_v14, %v331_v14  ;;  %v592_v18 = vpop.f32.mrb[3].mxu1 }
 0x238   :  { %v336_v19 = vrot.slane %v335_v16, 4  ;;  %v344_v20 = vadd.f32 %v343_v17, %v342_v15 }
 0x23a   :  { %v337_v21 = vadd.f32 %v336_v19, %v335_v16  ;;  %v345_v22 = vrot.slane %v344_v20, 4 }
 0x23c   :  { %v338_v23 = vrot.slane %v337_v21, 2  ;;  %v346_v24 = vadd.f32 %v345_v22, %v344_v20 }
 0x23e   :  { %v339_v25 = vadd.f32 %v338_v23, %v337_v21  ;;  %v347_v26 = vrot.slane %v346_v24, 2 }
 0x240   :  { %v340_v27 = vrot.slane %v339_v25, 1  ;;  %v348_v28 = vadd.f32 %v347_v26, %v346_v24 }
 0x242   :  { %v341_v0 = vadd.f32 %v340_v27, %v339_v25  ;;  %v349_v29 = vrot.slane %v348_v28, 1 }
 0x244   :  { %v350_v30 = vadd.f32 %v349_v29, %v348_v28  ;;  %v351_v31 = vmul.f32 0.083333336, %v341_v0 }
 0x246   :  { %v352_v32 = vmul.f32 0.083333336, %v350_v30  ;;  %v353_v33 = vmul.f32 %v351_v31, %v351_v31 }
 0x248   :  { %v354_v34 = vsub.f32 %v352_v32, %v353_v33 }
 0x24a   :  { %v355_v35 = vmax.f32 %v354_v34, 0.0 }
 0x24c   :  { %v357_v36 = vadd.f32 1e-05, %v355_v35 }
 0x24e   :  { %646 = vrsqrt.f32 %v357_v36 }
 0x258   :  { %v647_v38 = vpop.eup %646 }
 0x259   :  { %v359_v39 = vmul.f32 %v647_v38, %v356_v37 }
 0x25b   :  { %v361_v41 = vmul.f32 %v359_v39, %v351_v31  ;;  %v366_v42 = vrot.slane %v359_v39, %v849_v49 }
 0x25d   :  { %v362_v43 = vsub.f32 %v360_v40, %v361_v41  ;;  %v367_v44 = vmul.f32 %v366_v42, %v328_v12  ;;  %v368_v45 = vmul.f32 %v366_v42, %v331_v14 }
 0x25f   :  { %v372_v46 = vrot.slane %v362_v43, %v849_v49 }
 0x261   :  { %v373_v47 = vadd.f32 %v372_v46, %v367_v44  ;;  %v374_v48 = vadd.f32 %v372_v46, %v368_v45 }
 0x263   :  { %v376_v50 = vmax.f32 %v374_v48, 0.0  ;;  %v375_v52 = vmax.f32 %v373_v47, 0.0 }
 0x265   :  { %v378_v51 = vmul.f32 %v857_v62, %v376_v50 }
 0x267   :  { %v379_v53 = vpack.c.bf16 %v378_v51, %v375_v52 }
 0x269   :  { %610 = vmatmul.mubr.bf16.vlgmr.msra.gmra.mrb[4].mxu0 %v379_v53 }
 0x33c   :  { %v485_v55 = vpop.f32.mrb[4].mxu0 }
 0x33d   :  { %v486_v56 = vadd.f32 %v517_v54, %v485_v55  ;;  %v611_v57 = vpop.f32.mrb[5].mxu0 }
 0x33e   :  { %v488_v58 = vpop.f32.mrb[6].mxu0 }
 0x33f   :  { %492 = vst [vmem:[%s892_s7] sm:$0xff] %v486_v56  ;;  %v489_v49 = vadd.f32 %v517_v54, %v488_v58  ;;  %v612_v59 = vpop.f32.mrb[7].mxu0 }
 0x341   :  { %493 = vst [vmem:[%s892_s7 + $0x8] sm:$0xff] %v489_v49 }
 0x342   :  { %498 = vsyncpa [#allocation3], 1 }
 0x343   :  { %499 = vsyncpa [#allocation5], 1 }

</bundles_post_ra>
